<compile_context>
chip_gen: v5e
topology: v5e:2x2
jax: 0.10.0
libtpu: 0.0.40
codegen_flags: <defaults>
</compile_context>

<pallas_src>
import functools

import jax
import jax.numpy as jnp
from jax.experimental import pallas as pl
from jax.experimental.pallas import tpu as pltpu


# --------------------------------------------------------------------------- #
# Kernels
# --------------------------------------------------------------------------- #
def _fc_kernel(x_ref, w_ref, b_ref, o_ref, *, relu_max_clip):
    """Single-K-block path: o = clamp(x @ w + b, 0, clip).  w is (K, N)."""
    y = jnp.dot(x_ref[...], w_ref[...], preferred_element_type=jnp.float32)
    y = y + b_ref[...]
    o_ref[...] = jnp.clip(y, 0.0, float(relu_max_clip)).astype(o_ref.dtype)


def _fc_kernel_kacc_f32out(x_ref, w_ref, b_ref, o_ref, *, relu_max_clip):
    """K-tiled path, f32 output: accumulate directly into the resident o block."""
    k = pl.program_id(2)

    @pl.when(k == 0)
    def _():
        o_ref[...] = jnp.zeros_like(o_ref)

    o_ref[...] += jnp.dot(x_ref[...], w_ref[...],
                          preferred_element_type=jnp.float32)

    @pl.when(k == pl.num_programs(2) - 1)
    def _():
        o_ref[...] = jnp.clip(o_ref[...] + b_ref[...], 0.0, float(relu_max_clip))


def _fc_kernel_kacc(x_ref, w_ref, b_ref, o_ref, acc_ref, *, relu_max_clip):
    """K-tiled path, non-f32 output: f32 VMEM accumulator + cast epilogue."""
    k = pl.program_id(2)

    @pl.when(k == 0)
    def _():
        acc_ref[...] = jnp.zeros_like(acc_ref)

    acc_ref[...] += jnp.dot(x_ref[...], w_ref[...],
                            preferred_element_type=jnp.float32)

    @pl.when(k == pl.num_programs(2) - 1)
    def _():
        o_ref[...] = jnp.clip(acc_ref[...] + b_ref[...], 0.0,
                              float(relu_max_clip)).astype(o_ref.dtype)


# --------------------------------------------------------------------------- #
# Wrapper
# --------------------------------------------------------------------------- #
def _round_up(x, m):
    return ((x + m - 1) // m) * m


def _vmem_capacity_bytes():
    """Per-core VMEM capacity; conservative 64 MiB (v7x) fallback."""
    try:
        return int(pltpu.get_tpu_info().vmem_capacity_bytes)
    except Exception:
        return 64 * 1024 * 1024


def fully_connected_forward(x, weight, bias, *, relu_max_clip=20, dropout=0.0,
                            training=False, compute_dtype=None, block_m=256,
                            block_k=None):
    """Pallas implementation of FullyConnected.forward (eval-mode dropout).

    Args:
      x:      (..., n_feature) float array.
      weight: (n_hidden, n_feature) -- PyTorch Linear layout; transposed once here.
      bias:   (n_hidden,)
      compute_dtype: matmul operand dtype. Pass jnp.bfloat16 on v6e/v7x for full
        MXU rate (f32 accumulation is always used). Defaults to x.dtype for
        bit-faithful Linear numerics.
      block_m: row-tile cap (256 default; 128 is a good choice on v5e).
      block_k: optional explicit K tile (must divide K).
    Returns:
      (..., n_hidden) array, same dtype as x.
    """
    # TODO(synk): training-mode dropout (pltpu.prng_* Bernoulli mask) not implemented;
    # eval-mode dropout is identity, matching F.dropout(x, p, training=False).
    del dropout, training

    orig_shape = x.shape
    out_dtype = x.dtype
    K = orig_shape[-1]
    N, Kw = weight.shape
    assert Kw == K, (weight.shape, K)

    if compute_dtype is None:
        compute_dtype = x.dtype
    compute_dtype = jnp.dtype(compute_dtype)

    # Operand prep in the wrapper: cast once (halves DMA bytes for bf16) and
    # pre-transpose the reused weight to (K, N) -> plain NN contraction.
    x2d = x.reshape(-1, K).astype(compute_dtype)
    wkn = jnp.transpose(weight).astype(compute_dtype)          # (K, N)
    b2d = bias.reshape(1, N).astype(jnp.float32)

    # Pad narrow hidden dims up to one full 128-lane output block (unmasked vst).
    N_p = N
    if N < 128:
        N_p = 128
        wkn = jnp.pad(wkn, ((0, 0), (0, N_p - N)))
        b2d = jnp.pad(b2d, ((0, 0), (0, N_p - N)))

    M = x2d.shape[0]
    eb = compute_dtype.itemsize
    ob = jnp.dtype(out_dtype).itemsize
    sub = 8 if eb >= 4 else 16                 # sublane granularity (f32 / bf16)

    vmem_cap = _vmem_capacity_bytes()
    budget = int(0.55 * vmem_cap)              # leave headroom for compiler scratch

    def footprint(tm, tn, tk):
        f = 2 * tm * tk * eb                   # x tiles (double-buffered)
        f += 2 * tk * tn * eb                  # weight tiles
        f += 2 * 8 * max(tn, 128) * 4          # bias (vreg-padded)
        f += 2 * tm * tn * ob                  # output tiles
        if tk < K and jnp.dtype(out_dtype) != jnp.float32:
            f += tm * tn * 4                   # f32 accumulator scratch
        return f

    tile_m = min(block_m, _round_up(max(M, 1), sub))

    # N tiles: full-N first (operand read exactly once along that axis), then
    # lane-dense 128-aligned tiles; ragged trailing N blocks are masked.
    tn_cands = [N_p] + [t for t in (1024, 512, 256, 128) if t < N_p]
    # K tiles must divide K (ragged K blocks would accumulate garbage).
    if block_k is not None:
        assert block_k == K or K % block_k == 0, "block_k must divide K"
        tk_cands = [block_k]
    else:
        tk_cands = [K] + [t for t in (4096, 2048, 1024, 512, 256)
                          if t < K and K % t == 0]

    tile_n = tile_k = None
    for tn in tn_cands:
        for tk in tk_cands:
            if footprint(tile_m, tn, tk) <= budget:
                tile_n, tile_k = tn, tk
                break
        if tile_n is not None:
            break
    if tile_n is None:
        tile_n, tile_k = tn_cands[-1], tk_cands[-1]
        while tile_m > sub and footprint(tile_m, tile_n, tile_k) > budget:
            tile_m = max(sub, _round_up(tile_m // 2, sub))

    grid_m = pl.cdiv(M, tile_m)
    grid_n = pl.cdiv(N_p, tile_n)
    grid_k = pl.cdiv(K, tile_k)

    # Megacore (v7x: 2 TCs sharded over "parallel" axes): guarantee >=2 parallel
    # grid points when the problem allows it. Harmless on 1-TC chips.
    if grid_m * grid_n == 1 and M > sub:
        tile_m = max(sub, _round_up((M + 1) // 2, sub))
        grid_m = pl.cdiv(M, tile_m)

    # Grid-axis order: re-stream the operand that costs fewer HBM bytes.
    if grid_k == 1:
        bytes_m_outer = M * K * eb + (grid_m if grid_n > 1 else 1) * N_p * K * eb
        bytes_n_outer = (grid_n if grid_m > 1 else 1) * M * K * eb + N_p * K * eb
        m_outer = bytes_m_outer <= bytes_n_outer
    else:
        m_outer = True          # both orders re-stream equally when K is tiled

    if grid_k == 1:
        kernel = functools.partial(_fc_kernel, relu_max_clip=relu_max_clip)
        scratch = []
        if m_outer:
            grid = (grid_m, grid_n)
            x_map = lambda i, j: (i, 0)
            w_map = lambda i, j: (0, j)
            b_map = lambda i, j: (0, j)
            o_map = lambda i, j: (i, j)
        else:
            grid = (grid_n, grid_m)
            x_map = lambda j, i: (i, 0)
            w_map = lambda j, i: (0, j)
            b_map = lambda j, i: (0, j)
            o_map = lambda j, i: (i, j)
        dim_sem = ("parallel", "parallel")
        x_streams = 1 if m_outer else (grid_n if grid_m > 1 else 1)
        w_streams = (grid_m if grid_n > 1 else 1) if m_outer else 1
    else:
        if jnp.dtype(out_dtype) == jnp.float32:
            kernel = functools.partial(_fc_kernel_kacc_f32out,
                                       relu_max_clip=relu_max_clip)
            scratch = []
        else:
            kernel = functools.partial(_fc_kernel_kacc,
                                       relu_max_clip=relu_max_clip)
            scratch = [pltpu.VMEM((tile_m, tile_n), jnp.float32)]
        grid = (grid_m, grid_n, grid_k)
        x_map = lambda i, j, k: (i, k)
        w_map = lambda i, j, k: (k, j)
        b_map = lambda i, j, k: (0, j)
        o_map = lambda i, j, k: (i, j)
        dim_sem = ("parallel", "parallel", "arbitrary")
        x_streams, w_streams = grid_n, grid_m

    fp = footprint(tile_m, tile_n, tile_k)
    vmem_limit = max(int(1.5 * fp) + (4 << 20), 32 << 20)
    vmem_limit = min(vmem_limit, int(0.85 * vmem_cap))
    vmem_limit = max(vmem_limit, fp + (2 << 20))
    vmem_limit = int(min(vmem_limit, vmem_cap))

    cost = pl.CostEstimate(
        flops=2 * M * K * N_p,
        transcendentals=0,
        bytes_accessed=int(x_streams * M * K * eb + w_streams * N_p * K * eb
                           + N_p * 4 + M * N_p * ob),
    )

    out = pl.pallas_call(
        kernel,
        out_shape=jax.ShapeDtypeStruct((M, N_p), out_dtype),
        grid_spec=pltpu.PrefetchScalarGridSpec(
            num_scalar_prefetch=0,
            grid=grid,
            in_specs=[
                pl.BlockSpec((tile_m, tile_k), x_map),    # x rows     (M, K)
                pl.BlockSpec((tile_k, tile_n), w_map),    # weight     (K, N)
                pl.BlockSpec((1, tile_n), b_map),         # bias       (1, N)
            ],
            out_specs=pl.BlockSpec((tile_m, tile_n), o_map),
            scratch_shapes=scratch,
        ),
        compiler_params=pltpu.CompilerParams(
            dimension_semantics=dim_sem,
            vmem_limit_bytes=vmem_limit),
        cost_estimate=cost,
    )(x2d, wkn, b2d)

    if N_p != N:
        out = out[:, :N]
    return out.reshape(*orig_shape[:-1], N)


# --------------------------------------------------------------------------- #
# Reference + tests
# --------------------------------------------------------------------------- #
def _reference(x, weight, bias, relu_max_clip=20):
    y = jnp.einsum("...k,nk->...n", x, weight) + bias
    return jnp.clip(jnp.maximum(y, 0.0), 0.0, float(relu_max_clip))


if __name__ == "__main__":
    key = jax.random.PRNGKey(0)
    kx, kw, kb, k2 = jax.random.split(key, 4)

    # --- Test 1: main config (full-K, padded-N lane block), f32 ---------------
    B, T, n_feature, n_hidden = 2, 8, 32, 64
    x = jax.random.normal(kx, (B, T, n_feature), dtype=jnp.float32)
    bound = 1.0 / jnp.sqrt(jnp.float32(n_feature))
    weight = jax.random.uniform(kw, (n_hidden, n_feature),
                                minval=-bound, maxval=bound, dtype=jnp.float32)
    bias = jax.random.uniform(kb, (n_hidden,),
                              minval=-bound, maxval=bound, dtype=jnp.float32)

    out = jax.block_until_ready(
        fully_connected_forward(x, weight, bias, relu_max_clip=20,
                                dropout=0.5, training=False))
    ref = _reference(x, weight, bias)
    assert out.shape == (B, T, n_hidden), out.shape
    assert jnp.allclose(out, ref, atol=1e-5, rtol=1e-5), "f32 mismatch vs reference"

    # --- Test 2: bf16 compute path (wrapper-side cast), f32 accumulation ------
    out_bf16 = jax.block_until_ready(
        fully_connected_forward(x, weight, bias, compute_dtype=jnp.bfloat16))
    assert out_bf16.shape == (B, T, n_hidden)
    assert jnp.allclose(out_bf16, ref, atol=1e-1, rtol=1e-1), "bf16 mismatch"

    # --- Test 3: K-tiled path (grid_k > 1, accumulate into f32 output) --------
    K2, N2 = 256, 128
    kx2, kw2, kb2 = jax.random.split(k2, 3)
    x2 = jax.random.normal(kx2, (B, T, K2), dtype=jnp.float32)
    bound2 = 1.0 / jnp.sqrt(jnp.float32(K2))
    w2 = jax.random.uniform(kw2, (N2, K2), minval=-bound2, maxval=bound2,
                            dtype=jnp.float32)
    b2 = jax.random.uniform(kb2, (N2,), minval=-bound2, maxval=bound2,
                            dtype=jnp.float32)
    out2 = jax.block_until_ready(
        fully_connected_forward(x2, w2, b2, block_k=128))
    ref2 = _reference(x2, w2, b2)
    assert jnp.allclose(out2, ref2, atol=1e-3, rtol=1e-3), "K-tiled mismatch"

    print("KERNEL_OK")
</pallas_src>

<mosaic_0001>
module attributes {stable_mosaic.version = 11 : i64} {
  func.func @_fc_kernel(%arg0: i32, %arg1: i32, %arg2: memref<8x32xf32, #tpu.memory_space<vmem>>, %arg3: memref<32x128xf32, #tpu.memory_space<vmem>>, %arg4: memref<1x128xf32, #tpu.memory_space<vmem>>, %arg5: memref<8x128xf32, #tpu.memory_space<vmem>>) attributes {dimension_semantics = [#tpu.dimension_semantics<parallel>, #tpu.dimension_semantics<parallel>], iteration_bounds = array<i64: 2, 1>, scalar_prefetch = 0 : i64, scratch_operands = 0 : i64, tpu.core_type = #tpu.core_type<tc>, window_params = [{transform_indices = @transform_0, window_bounds = array<i64: 8, 32>}, {transform_indices = @transform_1, window_bounds = array<i64: 32, 128>}, {transform_indices = @transform_2, window_bounds = array<i64: 1, 128>}, {transform_indices = @transform_3, window_bounds = array<i64: 8, 128>}]} {
    %c0 = arith.constant 0 : index
    %c0_0 = arith.constant 0 : index
    %0 = vector.load %arg2[%c0, %c0_0] : memref<8x32xf32, #tpu.memory_space<vmem>>, vector<8x32xf32>
    %c0_1 = arith.constant 0 : index
    %c0_2 = arith.constant 0 : index
    %1 = vector.load %arg3[%c0_1, %c0_2] : memref<32x128xf32, #tpu.memory_space<vmem>>, vector<32x128xf32>
    %cst = arith.constant dense<0.000000e+00> : vector<8x128xf32>
    %2 = tpu.matmul %0, %1, %cst {dimension_numbers = #tpu.dot_dimension_numbers<[1], [0], [0], [1], [0, 0, 1, 1], [], []>} : vector<8x32xf32>, vector<32x128xf32>, vector<8x128xf32> -> vector<8x128xf32>
    %c0_3 = arith.constant 0 : index
    %c0_4 = arith.constant 0 : index
    %3 = vector.load %arg4[%c0_3, %c0_4] : memref<1x128xf32, #tpu.memory_space<vmem>>, vector<1x128xf32>
    %4 = vector.broadcast %3 : vector<1x128xf32> to vector<8x128xf32>
    %5 = arith.addf %2, %4 : vector<8x128xf32>
    %cst_5 = arith.constant 0.000000e+00 : f32
    %cst_6 = arith.constant 2.000000e+01 : f32
    %6 = vector.broadcast %cst_5 : f32 to vector<8x128xf32>
    %7 = arith.maximumf %6, %5 : vector<8x128xf32>
    %8 = vector.broadcast %cst_6 : f32 to vector<8x128xf32>
    %9 = arith.minimumf %8, %7 : vector<8x128xf32>
    %c0_7 = arith.constant 0 : index
    %c0_8 = arith.constant 0 : index
    %10 = vector.load %arg5[%c0_7, %c0_8] : memref<8x128xf32, #tpu.memory_space<vmem>>, vector<8x128xf32>
    tpu.vector_store %arg5[%c0_7, %c0_8], %9 {strides = array<i32>} : memref<8x128xf32, #tpu.memory_space<vmem>>, vector<8x128xf32>,
    return
  }
  func.func @transform_0(%arg0: i32, %arg1: i32) -> (i32, i32) {
    %c0_i32 = arith.constant 0 : i32
    %c0_i32_0 = arith.constant 0 : i32
    return %arg0, %c0_i32 : i32, i32
  }
  func.func @transform_1(%arg0: i32, %arg1: i32) -> (i32, i32) {
    %c0_i32 = arith.constant 0 : i32
    %c0_i32_0 = arith.constant 0 : i32
    return %c0_i32, %arg1 : i32, i32
  }
  func.func @transform_2(%arg0: i32, %arg1: i32) -> (i32, i32) {
    %c0_i32 = arith.constant 0 : i32
    %c0_i32_0 = arith.constant 0 : i32
    return %c0_i32, %arg1 : i32, i32
  }
  func.func @transform_3(%arg0: i32, %arg1: i32) -> (i32, i32) {
    %c0_i32 = arith.constant 0 : i32
    return %arg0, %arg1 : i32, i32
  }
}

</mosaic_0001>

<bundles_post_ra>
// kernel: tpu_custom_call.1
= control target key start
LH: loop header
LB: loop body
LE: loop exit
PB: predicated region body
PF: predicated region fallthrough
CT: control target
= control target key end

     0   :  { %8 = vsyncpa [#allocation3], 0  ;;  %s806_s0 = inlined_call_operand.hbm [shape: f32[16,32], index: 0, kind: input, shape index: {}]   ;;  %s807_s1 = inlined_call_operand.hbm [shape: f32[32,128], index: 1, kind: input, shape index: {}]   ;;  %s808_s2 = inlined_call_operand.vmem [shape: f32[1,128], index: 2, kind: input, shape index: {}]   ;;  %s809_s3 = inlined_call_operand.hbm [shape: f32[16,128], index: 3, kind: output, shape index: {}]  }
   0x1   :  { %10 = vsyncpa [#allocation3 + $0x1], 0 }
   0x2   :  { %11 = vsyncpa [#allocation6], 0 }
   0x3   :  { %12 = vsyncpa [#allocation4], 0 }
   0x4   :  { %14 = vsyncpa [#allocation4 + $0x1], 0  ;;  %s660_s12 = smov 0   ;;  %s662_s13 = smov 0  }
   0x5   :  { %s664_s14 = smov 0   ;;  %s666_s15 = smov 0  }
   0x6   :  { %s668_s16 = smov 0   ;;  %s670_s17 = smov 0  }
   0x7 LB: > { %s396_s18 = sadd.s32 4294967295, %s635_s17   ;;  %p398_p0 = scmp.ge.s32.totalorder %s635_s17, 1  ;;  %s635_s17 = sphi %s670_s17, %s20_s17   ;;  %s631_s16 = sphi %s668_s16, %s820_s16   ;;  %s627_s15 = sphi %s666_s15, %s819_s15   ;;  %s623_s14 = sphi %s664_s14, %s818_s14   ;;  %s619_s13 = sphi %s662_s13, %s817_s13   ;;  %s615_s12 = sphi %s660_s12, %s816_s12  }
   0x8   : > { %p692_p1 = scmp.eq.s32.totalorder %s396_s18, 0  ;;  %p143_p2 = scmp.lt.s32.totalorder %s635_s17, 3 }
   0x9   : > { %s156_s22 = sshll.u32 %s807_s1, 4  ;;  %s637_s24 = smov [#allocation5]   ;;  %s157_s22 = int_to_ptr.hbm [resolvable:$true] %s156_s22 }
   0xa   : > { %p700_p3 = pnand %p398_p0, %p143_p2  ;;  %s158_s25 = sshll.u32 %s637_s24, 4  ;;  %s159_s25 = int_to_ptr.vmem [resolvable:$true] %s158_s25 }
   0xb   : > { %p401_p6 = scmp.ge.s32.totalorder %s635_s17, 2  ;;  %s638_s26 = smov 128  }
   0xc   : > { %p421_p4 = pneg %p700_p3  ;;  %s639_s27 = smov 8  }
   0xd   : > { %s397_s28 = sadd.s32 4294967294, %s635_s17   ;;  %s32_s29 = sadd.s32 1, %s631_s16 }
   0xe   : > { %p422_p5 = pnand %p421_p4, %p692_p1  ;;  %s39_s30 = sadd.s32 1, %s623_s14 }
   0xf   : > { %p34_p7 = scmp.ge.s32.totalorder %s32_s29, 2  ;;  %p46_p8 = scmp.ne.s32.totalorder %s623_s14, %s619_s13 }
  0x10   : > { %424 = dma.hbm_to_vmem [thread:$0]  (!%p422_p5), %s157_s22, 512, %s159_s25, [#allocation6], %s638_s26, %s638_s26, %s639_s27  }
  0x11   : > { %p47_p9 = scmp.eq.s32.totalorder %s635_s17, 0  ;;  %p52_p10 = scmp.ne.s32.totalorder %s619_s13, %s615_s12 }
  0x12   : > { %s822_s29 = smov (%p34_p7, %s32_s29), 0  ;;  %p130_p13 = scmp.eq.s32.totalorder %s396_s18, 1 }
  0x13   : > { %p719_p11 = por %p47_p9, %p46_p8  ;;  %p725_p12 = por %p692_p1, %p52_p10 }
  0x14   : > { %s36_s6 = ssub.s32 %s631_s16, %s822_s29  ;;  %p136_p2 = scmp.eq.s32.totalorder %s397_s28, 1 }
  0x15   : > { %p37_p0 = scmp.eq.s32.totalorder %s36_s6, 0  ;;  %p731_p4 = por %p130_p13, %p46_p8 }
  0x16   : > { %p434_p5 = scmp.lt.s32.totalorder %s635_s17, 2  ;;  %p739_p7 = por %p136_p2, %p52_p10 }
  0x17   : > { %s737_s8 = scalar_select %p37_p0, %s623_s14, %s39_s30  }
  0x18   : > { %s178_s10 = sand.u32 1, %s623_s14   ;;  %s403_s20 = sshll.u32 %s631_s16, 3 }
  0x19   : > { %s402_s11 = sshll.u32 %s178_s10, 3  ;;  %s186_s18 = scalar_lea.hbm %s806_s0, %s403_s20 }
  0x1a   : > { %s182_s24 = scalar_lea.vmem [#allocation2], %s402_s11  ;;  %s188_s26 = sshll.u32 %s186_s18, 4  ;;  %s189_s26 = int_to_ptr.hbm [resolvable:$true] %s188_s26 }
  0x1b   : > { %s190_s25 = sshll.u32 %s182_s24, 4  ;;  %p426_p8 = pnand %p434_p5, %p719_p11  ;;  %s191_s25 = int_to_ptr.vmem [resolvable:$true] %s190_s25 }
  0x1c   : > { %s179_s27 = scalar_lea.sflag [#allocation3], %s178_s10  ;;  %199 = sbr.rel (%p700_p3) target bundleno = 179 (0xb3), region = 32 }
  0x1d   : > { %428 = dma.hbm_to_vmem [thread:$0]  (!%p426_p8), %s189_s26, 128, %s191_s25, %s179_s27  }
  0x1e   : > { %s753_s28 = sand.u32 (!%p700_p3), 1, %s619_s13  }
  0x1f   : > { %s405_s30 = sshll.u32 (!%p700_p3), %s753_s28, 3  ;;  %s202_s6 = scalar_lea.sflag (!%p700_p3), [#allocation3], %s753_s28 }
  0x20   : > { %s205_s11 = scalar_lea.vmem (!%p700_p3), [#allocation2], %s405_s30 }
  0x21   : > { %602 = dma.done.wait (%p725_p12), %s202_s6, 128  }
  0x22   : > { %604 = vsyncadd (%p725_p12), %s202_s6, 4294967168 }
  0x23   : > { %606 = dma.done.wait (%p692_p1), [#allocation6], 512  }
  0x24   : > { %608 = vsyncadd (%p692_p1), [#allocation6], 4294966784  ;;  %v244_v0 = vld [vmem:[#allocation5 + $0x18] sm:$0xff]  ;;  %v243_v1 = vld [vmem:[#allocation5 + $0x10] sm:$0xff]  ;;  %vm249_vm0 = vcmask 261120   ;;  %s410_s23 = sshll.u32 %s627_s15, 3 }
  0x25   : > { %265 = vmatpush.msra.mxu0 %v244_v0  ;;  %v242_v2 = vld [vmem:[#allocation5 + $0x8] sm:$0xff]  ;;  %v241_v3 = vld [vmem:[#allocation5] sm:$0xff]  ;;  %v240_v4 = vld [vmem:[%s205_s11] sm:$0xff]  ;;  %s288_s20 = scalar_lea.hbm %s809_s3, %s410_s23  ;;  %s236_s21 = scalar_lea.vmem [#allocation7], %s405_s30 }
  0x26   : > { %v488_v5 = vld [vmem:[%s808_s2] ss:$0 sm:$0xff]  ;;  %s290_s22 = sshll.u32 %s236_s21, 4  ;;  %s292_s18 = sshll.u32 %s288_s20, 4  ;;  %s291_s22 = int_to_ptr.vmem [resolvable:$true] %s290_s22  ;;  %s293_s18 = int_to_ptr.hbm [resolvable:$true] %s292_s18 }
  0x27   : > { %266 = vmatpush.msra.mxu0 %v243_v1  ;;  %s277_s15 = scalar_lea.sflag [#allocation4], %s753_s28  ;;  %s563_s24 = sshra.s32 %s293_s18, 4  ;;  %s564_s24 = int_to_ptr.hbm [resolvable:$true] %s563_s24 }
  0x28   : > { %s565_s25 = scalar_lea.hbm %s564_s24, 8  ;;  %s569_s6 = scalar_lea.hbm %s809_s3, 16 }
  0x29   : > { %267 = vmatpush.msra.mxu0 %v242_v2  ;;  %p566_p1 = scmp.ne.s32.totalorder %s564_s24, %s565_s25  ;;  %p570_p10 = scmp.lt.s32.totalorder %s564_s24, %s809_s3 }
  0x2a   : > { %p571_p11 = scmp.lt.s32.totalorder %s569_s6, %s565_s25 }
  0x2b   : > { %268 = vmatpush.msra.mxu0 %v241_v3  ;;  %p567_p3 = pnand %p566_p1, %p731_p4 }
  0x2c   : > { %408 = vmatmul.msk.f32.vlgmr.msra.gmra.mxu0 %vm249_vm0, %v240_v4  ;;  %p572_p12 = por %p571_p11, %p570_p10 }
  0x2d   : > { %p568_p9 = pneg %p567_p3 }
  0x2f   : > { %p573_p13 = pnand %p572_p12, %p568_p9 }
  0xa9   : > { %v270_v6 = vpop.f32.mrf.mxu0 }
  0xaa   : > { %v271_v7 = vadd.f32 %v488_v5, %v270_v6 }
  0xac   : > { %v273_v8 = vmax.f32 %v271_v7, 0.0 }
  0xae   : > { %v274_v9 = vmin.f32 %v273_v8, 20.0 }
  0xb0   : > { %275 = vst [vmem:[%s236_s21] sm:$0xff] %v274_v9 }
  0xb1   : > { %576 = shalt.err (!%p573_p13)
}
  0xb2   : > { %419 = dma.vmem_to_hbm [thread:$0]  (%p731_p4), %s291_s22, 128, %s293_s18, %s277_s15  }
  0xb3 PF: > { %s304_s28 = sand.u32 1, %s615_s12   ;;  %p430_p0 = pnand %p401_p6, %p739_p7 }
  0xb4   : > { %s305_s23 = scalar_lea.sflag [#allocation4], %s304_s28 }
  0xb5   : > { %p431_p2 = pneg %p430_p0 }
  0xb7   : > { %610 = dma.done.wait (%p431_p2), %s305_s23, 128  }
  0xb8   : > { %612 = vsyncadd (%p431_p2), %s305_s23, 4294967168  ;;  %s20_s17 = sadd.s32 1, %s635_s17   ;;  %s816_s12 = smov %s619_s13 }
  0xb9   : > { %p17_p5 = scmp.ge.s32.totalorder %s20_s17, 4   ;;  %s817_s13 = smov %s623_s14 }
  0xba   : > { %s818_s14 = smov %s737_s8  ;;  %s819_s15 = smov %s631_s16 }
  0xbb   : > { %s820_s16 = smov %s822_s29  ;;  %19 = sbr.rel (!%p17_p5) target bundleno = 7 (0x7), region = 85 }
  0xc0   :  { %311 = vsyncpa [#allocation3], 1 }
  0xc1   :  { %313 = vsyncpa [#allocation3 + $0x1], 1 }
  0xc2   :  { %314 = vsyncpa [#allocation6], 1 }
  0xc3   :  { %315 = vsyncpa [#allocation4], 1 }
  0xc4   :  { %317 = vsyncpa [#allocation4 + $0x1], 1 }

</bundles_post_ra>
